<compile_context>
chip_gen: v6e
topology: v6e:2x2x1
jax: 0.10.0
libtpu: 0.0.40
codegen_flags: <defaults>
</compile_context>

<pallas_src>
import jax
import jax.numpy as jnp
from jax.experimental import pallas as pl
from jax.experimental.pallas import tpu as pltpu


def _pick_lane_tile(hw):
    # Prefer 512-wide lane tiles (near HBM roofline); fall back to the full
    # extent (always a legal block dim) for odd sizes.
    for t in (512, 1024, 256, 128):
        if hw % t == 0:
            return t
    return hw


def _pick_row_tile(nc):
    # Row (sublane) tiles: multiples of 8 when possible; full extent otherwise.
    # Every candidate (and NC itself, since C == 2) is even, so channel pairs
    # never straddle a block boundary.
    for t in (256, 128, 64, 32, 16, 8):
        if nc % t == 0:
            return t
    return nc


def _kernel(w_ref, b_ref, buff_ref,          # scalar-prefetch (SMEM)
            x_ref, t_ref,                     # VMEM input tiles (RT, TILE)
            y_ref, loss_ref, buff_out_ref):   # outputs
    x = x_ref[...]                            # (RT, TILE) f32, lane-dense
    t = t_ref[...]

    # 1x1 conv weights / bias as SMEM scalars (weight stored row-major).
    w00 = w_ref[0]; w01 = w_ref[1]
    w10 = w_ref[2]; w11 = w_ref[3]
    b0 = b_ref[0];  b1 = b_ref[1]

    rt = x.shape[0]
    row = jax.lax.broadcasted_iota(jnp.int32, x.shape, 0)
    is_even = (row & 1) == 0                  # even row == channel 0 of a sample

    # Pair-swap adjacent rows (channel 0 <-> channel 1 of the same sample)
    # using two XLU sublane rolls + a select.  Keeps everything full-tile so
    # the output store below is a single unmasked vst stream.
    x_next = pltpu.roll(x, shift=rt - 1, axis=0)   # x_next[i] = x[(i+1) % rt]
    x_prev = pltpu.roll(x, shift=1, axis=0)        # x_prev[i] = x[(i-1) % rt]
    x_swap = jnp.where(is_even, x_next, x_prev)

    w_self = jnp.where(is_even, w00, w11)
    w_cross = jnp.where(is_even, w01, w10)
    b_row = jnp.where(is_even, b0, b1)

    # 1x1, 2-channel conv == scalar-broadcast FMAs on the VPU (a K=2 MXU
    # matmul would be <1% utilization).
    y = x * w_self + x_swap * w_cross + b_row
    y_ref[...] = y                            # full-tile unmasked store

    # Block-wise partial L1 sum; each grid step owns its own output row, so
    # this is safe under "parallel" core sharding.  XLU has ample slack in
    # this HBM-bound kernel, so the reduce is free filler.
    part = jnp.sum(jnp.abs(y - t))
    loss_ref[...] = jnp.full((1, 1, 128), part, jnp.float32)

    # Buffer update: test_buff += conv.bias[0].  Written identically on every
    # grid step (idempotent -> shard-safe), scalar path only.
    buff_out_ref[0] = buff_ref[0] + b0
    buff_out_ref[1] = buff_ref[1] + b0


def buffer_updating_model(inp_nchw, target_nchw, weight, bias, test_buff):
    """Forward pass of BufferUpdatingModel.

    Args:
      inp_nchw:    (N, 2, H, W) float32
      target_nchw: (N, 2, H, W) float32
      weight:      (2, 2)       float32   (1x1 conv kernel, squeezed)
      bias:        (2,)         float32
      test_buff:   (2,)         float32
    Returns:
      (y_nchw, loss_scalar, new_test_buff)
    """
    N, Cin, H, W = inp_nchw.shape
    Cout = weight.shape[0]
    HW = H * W
    NC = N * Cout

    # Free reshapes of contiguous NCHW: (N, C, H, W) -> (N*C, H*W).
    inp_r = inp_nchw.reshape(NC, HW)
    tgt_r = target_nchw.reshape(NC, HW)
    w_flat = weight.reshape(-1)               # (Cout*Cin,), row-major

    tile = _pick_lane_tile(HW)
    rt = _pick_row_tile(NC)
    grid_r = NC // rt
    grid_g = HW // tile

    grid_spec = pltpu.PrefetchScalarGridSpec(
        num_scalar_prefetch=3,                # w_flat, bias, test_buff -> SMEM
        grid=(grid_r, grid_g),
        in_specs=[
            pl.BlockSpec((rt, tile), lambda r, g, w, b, tb: (r, g)),   # inp
            pl.BlockSpec((rt, tile), lambda r, g, w, b, tb: (r, g)),   # target
        ],
        out_specs=[
            pl.BlockSpec((rt, tile), lambda r, g, w, b, tb: (r, g)),   # conv out
            pl.BlockSpec((1, 1, 128),                                  # loss partials
                         lambda r, g, w, b, tb: (r * grid_g + g, 0, 0)),
            pl.BlockSpec(memory_space=pltpu.MemorySpace.SMEM),         # new buffer
        ],
    )

    n_elems = NC * HW
    cost = pl.CostEstimate(
        flops=8 * n_elems,                    # conv FMAs + L1 diff/abs/sum
        transcendentals=0,
        bytes_accessed=3 * n_elems * 4 + 64,  # inp + target + y (f32) + scalars
    )

    y_r, loss_parts, buff_new = pl.pallas_call(
        _kernel,
        out_shape=(
            jax.ShapeDtypeStruct((NC, HW), jnp.float32),
            jax.ShapeDtypeStruct((grid_r * grid_g, 1, 128), jnp.float32),
            jax.ShapeDtypeStruct((test_buff.shape[0],), jnp.float32),
        ),
        grid_spec=grid_spec,
        compiler_params=pltpu.CompilerParams(
            dimension_semantics=("parallel", "arbitrary"),
            vmem_limit_bytes=32 * 1024 * 1024,
        ),
        cost_estimate=cost,
    )(w_flat, bias, test_buff, inp_r, tgt_r)

    # Finish the L1 mean from shard-safe per-block partials (hierarchical sum).
    loss = jnp.sum(loss_parts[:, 0, 0]) / float(n_elems)

    # Free reshape back to NCHW (same memory layout, no transpose).
    y_nchw = y_r.reshape(N, Cout, H, W)
    return y_nchw, loss, buff_new


if __name__ == "__main__":
    key = jax.random.PRNGKey(0)
    k_inp, k_tgt, k_w, k_b = jax.random.split(key, 4)

    N, C, H, W = 2, 2, 32, 32   # Conv2d(2, 2, 1) -> Cin = Cout = 2
    inp = jax.random.normal(k_inp, (N, C, H, W), dtype=jnp.float32)
    target = jax.random.normal(k_tgt, (N, C, H, W), dtype=jnp.float32)

    # Deterministic parameter init (synthetic; matches Conv2d(2,2,1) shapes).
    weight = jax.random.normal(k_w, (C, C), dtype=jnp.float32) * 0.5  # (Cout, Cin)
    bias = jax.random.normal(k_b, (C,), dtype=jnp.float32) * 0.1
    test_buff = jnp.zeros((2,), dtype=jnp.float32)

    y, loss, new_buff = jax.jit(buffer_updating_model)(
        inp, target, weight, bias, test_buff)
    jax.block_until_ready((y, loss, new_buff))

    # Sanity check against a pure-JAX reference.
    y_ref = jnp.einsum('nchw,oc->nohw', inp, weight) + bias[None, :, None, None]
    loss_ref = jnp.mean(jnp.abs(y_ref - target))
    buff_ref = test_buff + bias[0]
    assert jnp.allclose(y, y_ref, atol=1e-5, rtol=1e-5)
    assert jnp.allclose(loss, loss_ref, atol=1e-5, rtol=1e-5)
    assert jnp.allclose(new_buff, buff_ref, atol=1e-6)

    print("KERNEL_OK")
</pallas_src>

<mosaic_0001>
module attributes {stable_mosaic.version = 11 : i64} {
  func.func @_kernel(%arg0: i32, %arg1: i32, %arg2: memref<4xf32, #tpu.memory_space<smem>>, %arg3: memref<2xf32, #tpu.memory_space<smem>>, %arg4: memref<2xf32, #tpu.memory_space<smem>>, %arg5: memref<4x512xf32, #tpu.memory_space<vmem>>, %arg6: memref<4x512xf32, #tpu.memory_space<vmem>>, %arg7: memref<4x512xf32, #tpu.memory_space<vmem>>, %arg8: memref<1x1x128xf32, #tpu.memory_space<vmem>>, %arg9: memref<2xf32, #tpu.memory_space<smem>>) attributes {dimension_semantics = [#tpu.dimension_semantics<parallel>, #tpu.dimension_semantics<arbitrary>], iteration_bounds = array<i64: 1, 2>, scalar_prefetch = 3 : i64, scratch_operands = 0 : i64, tpu.core_type = #tpu.core_type<tc>, window_params = [{transform_indices = @transform_0, window_bounds = array<i64: 4, 512>}, {transform_indices = @transform_1, window_bounds = array<i64: 4, 512>}, {transform_indices = @transform_2, window_bounds = array<i64: 4, 512>}, {transform_indices = @transform_3, window_bounds = array<i64: 1, 1, 128>}, {transform_indices = @transform_4, window_bounds = array<i64: 2>}]} {
    %c0 = arith.constant 0 : index
    %c0_0 = arith.constant 0 : index
    %0 = vector.load %arg5[%c0, %c0_0] : memref<4x512xf32, #tpu.memory_space<vmem>>, vector<4x512xf32>
    %c0_1 = arith.constant 0 : index
    %c0_2 = arith.constant 0 : index
    %1 = vector.load %arg6[%c0_1, %c0_2] : memref<4x512xf32, #tpu.memory_space<vmem>>, vector<4x512xf32>
    %c0_3 = arith.constant 0 : index
    %2 = memref.load %arg2[%c0_3] : memref<4xf32, #tpu.memory_space<smem>>
    %c1 = arith.constant 1 : index
    %3 = memref.load %arg2[%c1] : memref<4xf32, #tpu.memory_space<smem>>
    %c2 = arith.constant 2 : index
    %4 = memref.load %arg2[%c2] : memref<4xf32, #tpu.memory_space<smem>>
    %c3 = arith.constant 3 : index
    %5 = memref.load %arg2[%c3] : memref<4xf32, #tpu.memory_space<smem>>
    %c0_4 = arith.constant 0 : index
    %6 = memref.load %arg3[%c0_4] : memref<2xf32, #tpu.memory_space<smem>>
    %c1_5 = arith.constant 1 : index
    %7 = memref.load %arg3[%c1_5] : memref<2xf32, #tpu.memory_space<smem>>
    %8 = tpu.iota {dimensions = array<i32: 0>} : vector<4x512xi32>
    %c1_i32 = arith.constant 1 : i32
    %9 = vector.broadcast %c1_i32 : i32 to vector<4x512xi32>
    %10 = arith.andi %8, %9 : vector<4x512xi32>
    %c0_i32 = arith.constant 0 : i32
    %11 = vector.broadcast %c0_i32 : i32 to vector<4x512xi32>
    %12 = arith.cmpi eq, %10, %11 : vector<4x512xi32>
    %c3_i32 = arith.constant 3 : i32
    %13 = tpu.dynamic_rotate %0 by %c3_i32 dim 0 : vector<4x512xf32>, i32 -> vector<4x512xf32>
    %c1_i32_6 = arith.constant 1 : i32
    %14 = tpu.dynamic_rotate %0 by %c1_i32_6 dim 0 : vector<4x512xf32>, i32 -> vector<4x512xf32>
    %15 = arith.select %12, %13, %14 : vector<4x512xi1>, vector<4x512xf32>
    %16 = vector.broadcast %2 : f32 to vector<4x512xf32>
    %17 = vector.broadcast %5 : f32 to vector<4x512xf32>
    %18 = arith.select %12, %16, %17 : vector<4x512xi1>, vector<4x512xf32>
    %19 = vector.broadcast %3 : f32 to vector<4x512xf32>
    %20 = vector.broadcast %4 : f32 to vector<4x512xf32>
    %21 = arith.select %12, %19, %20 : vector<4x512xi1>, vector<4x512xf32>
    %22 = vector.broadcast %6 : f32 to vector<4x512xf32>
    %23 = vector.broadcast %7 : f32 to vector<4x512xf32>
    %24 = arith.select %12, %22, %23 : vector<4x512xi1>, vector<4x512xf32>
    %25 = arith.mulf %0, %18 : vector<4x512xf32>
    %26 = arith.mulf %15, %21 : vector<4x512xf32>
    %27 = arith.addf %25, %26 : vector<4x512xf32>
    %28 = arith.addf %27, %24 : vector<4x512xf32>
    %c0_7 = arith.constant 0 : index
    %c0_8 = arith.constant 0 : index
    %29 = vector.load %arg7[%c0_7, %c0_8] : memref<4x512xf32, #tpu.memory_space<vmem>>, vector<4x512xf32>
    tpu.vector_store %arg7[%c0_7, %c0_8], %28 {strides = array<i32>} : memref<4x512xf32, #tpu.memory_space<vmem>>, vector<4x512xf32>,
    %30 = arith.subf %28, %1 : vector<4x512xf32>
    %31 = math.absf %30 : vector<4x512xf32>
    %32 = vector.shape_cast %31 : vector<4x512xf32> to vector<1x4x512xf32>
    %cst = arith.constant dense<0.000000e+00> : vector<1xf32>
    %33 = vector.multi_reduction <add>, %32, %cst [1, 2] : vector<1x4x512xf32> to vector<1xf32>
    %34 = vector.shape_cast %33 : vector<1xf32> to vector<1x1x1xf32>
    %35 = vector.extract %34[0, 0, 0] : f32 from vector<1x1x1xf32>
    %36 = vector.broadcast %35 : f32 to vector<1x1x128xf32>
    %c0_9 = arith.constant 0 : index
    %c0_10 = arith.constant 0 : index
    %c0_11 = arith.constant 0 : index
    %37 = vector.load %arg8[%c0_9, %c0_10, %c0_11] : memref<1x1x128xf32, #tpu.memory_space<vmem>>, vector<1x1x128xf32>
    tpu.vector_store %arg8[%c0_9, %c0_10, %c0_11], %36 {strides = array<i32>} : memref<1x1x128xf32, #tpu.memory_space<vmem>>, vector<1x1x128xf32>,
    %c0_12 = arith.constant 0 : index
    %38 = memref.load %arg4[%c0_12] : memref<2xf32, #tpu.memory_space<smem>>
    %39 = arith.addf %38, %6 : f32
    %c0_13 = arith.constant 0 : index
    %40 = memref.load %arg9[%c0_13] : memref<2xf32, #tpu.memory_space<smem>>
    memref.store %39, %arg9[%c0_13] : memref<2xf32, #tpu.memory_space<smem>>
    %c1_14 = arith.constant 1 : index
    %41 = memref.load %arg4[%c1_14] : memref<2xf32, #tpu.memory_space<smem>>
    %42 = arith.addf %41, %6 : f32
    %c1_15 = arith.constant 1 : index
    %43 = memref.load %arg9[%c1_15] : memref<2xf32, #tpu.memory_space<smem>>
    memref.store %42, %arg9[%c1_15] : memref<2xf32, #tpu.memory_space<smem>>
    return
  }
  func.func @transform_0(%arg0: i32, %arg1: i32, %arg2: memref<4xf32, #tpu.memory_space<smem>>, %arg3: memref<2xf32, #tpu.memory_space<smem>>, %arg4: memref<2xf32, #tpu.memory_space<smem>>) -> (i32, i32) {
    %c0_i32 = arith.constant 0 : i32
    return %arg0, %arg1 : i32, i32
  }
  func.func @transform_1(%arg0: i32, %arg1: i32, %arg2: memref<4xf32, #tpu.memory_space<smem>>, %arg3: memref<2xf32, #tpu.memory_space<smem>>, %arg4: memref<2xf32, #tpu.memory_space<smem>>) -> (i32, i32) {
    %c0_i32 = arith.constant 0 : i32
    return %arg0, %arg1 : i32, i32
  }
  func.func @transform_2(%arg0: i32, %arg1: i32, %arg2: memref<4xf32, #tpu.memory_space<smem>>, %arg3: memref<2xf32, #tpu.memory_space<smem>>, %arg4: memref<2xf32, #tpu.memory_space<smem>>) -> (i32, i32) {
    %c0_i32 = arith.constant 0 : i32
    return %arg0, %arg1 : i32, i32
  }
  func.func @transform_3(%arg0: i32, %arg1: i32, %arg2: memref<4xf32, #tpu.memory_space<smem>>, %arg3: memref<2xf32, #tpu.memory_space<smem>>, %arg4: memref<2xf32, #tpu.memory_space<smem>>) -> (i32, i32, i32) {
    %c2_i32 = arith.constant 2 : i32
    %0 = arith.muli %arg0, %c2_i32 : i32
    %1 = arith.addi %0, %arg1 : i32
    %c0_i32 = arith.constant 0 : i32
    %c0_i32_0 = arith.constant 0 : i32
    %c0_i32_1 = arith.constant 0 : i32
    return %1, %c0_i32, %c0_i32_0 : i32, i32, i32
  }
  func.func @transform_4(%arg0: i32, %arg1: i32, %arg2: memref<4xf32, #tpu.memory_space<smem>>, %arg3: memref<2xf32, #tpu.memory_space<smem>>, %arg4: memref<2xf32, #tpu.memory_space<smem>>) -> i32 {
    %c0_i32 = arith.constant 0 : i32
    %c0_i32_0 = arith.constant 0 : i32
    return %c0_i32 : i32
  }
}

</mosaic_0001>

<bundles_post_ra>
// kernel: buffer_updating_model.1
= control target key start
LH: loop header
LB: loop body
LE: loop exit
PB: predicated region body
PF: predicated region fallthrough
CT: control target
= control target key end

     0   :  { %s907_s0 = inlined_call_operand.vmem [shape: f32[4], index: 0, kind: input, shape index: {}]   ;;  %s908_s3 = inlined_call_operand.vmem [shape: f32[4,1024], index: 3, kind: input, shape index: {}]   ;;  %s909_s4 = inlined_call_operand.vmem [shape: f32[4,1024], index: 4, kind: input, shape index: {}]   ;;  %s910_s5 = inlined_call_operand.vmem [shape: f32[4,1024], index: 5, kind: output, shape index: {0}]   ;;  %s911_s6 = inlined_call_operand.vmem [shape: f32[2,1,128], index: 6, kind: output, shape index: {1}]   ;;  %s912_s7 = inlined_call_operand.hbm [shape: f32[2], index: 7, kind: output, shape index: {2}]   ;;  %s913_s1 = inlined_call_operand.vmem [shape: f32[2], index: 1, kind: input, shape index: {}]   ;;  %s914_s2 = inlined_call_operand.vmem [shape: f32[2], index: 2, kind: input, shape index: {}]  }
   0x1   :  { %s13_s26 = sshll.u32 %s907_s0, 4  ;;  %s17_s29 = sshll.u32 %s913_s1, 4  ;;  %s14_s26 = int_to_ptr.vmem [resolvable:$true] %s13_s26  ;;  %s18_s29 = int_to_ptr.vmem [resolvable:$true] %s17_s29 }
   0x2   :  { %s670_s30 = scalar_lea.vmem %s14_s26, 16  ;;  %p675_p1 = scmp.lt.s32.totalorder %s14_s26, %s14_s26 }
   0x3   :  { %p671_p0 = scmp.ne.s32.totalorder %s14_s26, %s670_s30  ;;  %p676_p2 = scmp.lt.s32.totalorder %s670_s30, %s670_s30 }
   0x5   :  { %p677_p3 = por %p676_p2, %p675_p1 }
   0x7   :  { %p678_p4 = pnand %p677_p3, %p671_p0 }
   0x9   :  { %681 = shalt.err (!%p678_p4)  }
   0xa   :  { %s746_s8 = smov [#allocation3]   ;;  %s682_s9 = scalar_lea.vmem %s18_s29, 16 }
   0xb   :  { %16 = dma.vmem_to_smem %s14_s26, 16, %s746_s8, [#allocation2] }
   0xc   :  { %p683_p5 = scmp.ne.s32.totalorder %s18_s29, %s682_s9  ;;  %p687_p6 = scmp.lt.s32.totalorder %s18_s29, %s18_s29 }
   0xd   :  { %p688_p7 = scmp.lt.s32.totalorder %s682_s9, %s682_s9 }
   0xf   :  { %p689_p8 = por %p688_p7, %p687_p6 }
  0x11   :  { %p690_p9 = pnand %p689_p8, %p683_p5 }
  0x13   :  { %693 = shalt.err (!%p690_p9)  }
  0x14   :  { %s747_s0 = smov [#allocation4]   ;;  %s21_s11 = sshll.u32 %s914_s2, 4  ;;  %s22_s11 = int_to_ptr.vmem [resolvable:$true] %s21_s11 }
  0x15   :  { %20 = dma.vmem_to_smem %s18_s29, 16, %s747_s0, [#allocation2] }
  0x16   :  { %s694_s12 = scalar_lea.vmem %s22_s11, 16  ;;  %p699_p11 = scmp.lt.s32.totalorder %s22_s11, %s22_s11 }
  0x17   :  { %p695_p10 = scmp.ne.s32.totalorder %s22_s11, %s694_s12  ;;  %p700_p12 = scmp.lt.s32.totalorder %s694_s12, %s694_s12 }
  0x19   :  { %p701_p13 = por %p700_p12, %p699_p11 }
  0x1b   :  { %p702_p0 = pnand %p701_p13, %p695_p10 }
  0x1d   :  { %705 = shalt.err (!%p702_p0)  }
  0x1e   :  { %s748_s13 = smov [#allocation5]  }
  0x1f   :  { %24 = dma.vmem_to_smem %s22_s11, 16, %s748_s13, [#allocation2] }
  0x20   :  { %728 = dma.done.wait [#allocation2], 48 }
  0x21   :  { %729 = vsyncadd [#allocation2], 4294967248 }
  0x22   :  { %26 = sfence }
  0x23   :  { %27 = vsyncpa [#allocation7], 0  ;;  %s800_s14 = smov 0   ;;  %s802_s15 = smov 0  }
  0x24   :  { %s804_s16 = smov 0  }
  0x25 LB: > { %s611_s2 = sadd.s32 4294967295, %s744_s16   ;;  %s42_s17 = sadd.s32 1, %s740_s15  ;;  %s744_s16 = sphi %s804_s16, %s33_s16   ;;  %s740_s15 = sphi %s802_s15, %s919_s15   ;;  %s736_s14 = sphi %s800_s14, %s918_s14  }
  0x26   : > { %p43_p1 = scmp.ge.s32.totalorder %s42_s17, 2  ;;  %p615_p2 = scmp.ge.s32.totalorder %s744_s16, 1 }
  0x27   : > { %p222_p3 = scmp.lt.s32.totalorder %s744_s16, 3 }
  0x28   : > { %s921_s17 = smov (%p43_p1, %s42_s17), 0 }
  0x29   : > { %p223_p4 = pnand %p615_p2, %p222_p3 }
  0x2a   : > { %s616_s18 = sshll.u32 (!%p223_p4), %s736_s14, 2  ;;  %s822_s19 = sld [smem:[#allocation3]] (!%p223_p4) }
  0x2b   : > { %226 = sbr.rel (%p223_p4) target bundleno = 287 (0x11f), region = 28  ;;  %p273_p5 = scmp.lt.s32.totalorder (!%p223_p4), %s616_s18, 7 }
  0x2c   : > { %s824_s20 = sld [smem:[#allocation3 + $0x1]] (!%p223_p4)  ;;  %p880_p6 = scmp.eq.s32.totalorder (!%p223_p4), %s611_s2, 1 }
  0x2d   : > { %s826_s21 = sld [smem:[#allocation3 + $0x2]] (!%p223_p4)  ;;  %p302_p7 = scmp.lt.s32.totalorder (!%p223_p4), %s736_s14, 1 }
  0x2e   : > { %s828_s22 = sld [smem:[#allocation3 + $0x3]] (!%p223_p4) }
  0x2f   : > { %s832_s24 = sld [smem:[#allocation4]] (!%p223_p4) }
  0x30   : > { %v317_v0 = vlaneseq  ;;  %v749_v1 = vmov 839922192   ;;  %s923_s18 = smov (!%p273_p5, %s616_s18), 7  ;;  %s838_s28 = sld [smem:[#allocation4 + $0x1]]  ;;  %vm327_vm0 = vcmask 1047556   ;;  %v368_v24 = vstv %s822_s19 }
  0x31   : > { %v379_v2 = vunpack.c.l.s4 %v749_v1  ;;  %s830_s23 = sshll.u32 %s923_s18, 2  ;;  %vm425_vm2 = vcmask 1043456   ;;  %s444_s10 = sld [smem:[#allocation5]] }
  0x32   : > { %v318_v3 = vshrl.u32 %v317_v0, 7  ;;  %s278_s27 = scalar_lea.vmem %s908_s3, %s830_s23  ;;  %v371_v13 = vstv %s824_s20  ;;  %s288_s8 = scalar_lea.vmem %s909_s4, %s830_s23 }
  0x33   : > { %v380_v5 = vunpack.c.0.s8 %v379_v2  ;;  %v307_v6 = vld [vmem:[%s278_s27] sm:$0xff]  ;;  %v308_v7 = vld [vmem:[%s278_s27 + $0x8] sm:$0xff]  ;;  %v372_v14 = vstv %s826_s21  ;;  %s298_s1 = scalar_lea.vmem %s910_s5, %s830_s23  ;;  %s626_s11 = sld [smem:[#allocation5 + $0x1]] }
  0x34   : > { %v319_v4 = vand.u32 1, %v318_v3  ;;  %v323_v8 = vcombine.high %v307_v6, %v307_v6  ;;  %v324_v9 = vcombine.high %v308_v7, %v308_v7  ;;  %v328_v10 = vrot.slane %v307_v6, 4  ;;  %v309_v53 = vld [vmem:[%s288_s8] sm:$0xff]  ;;  %v310_v54 = vld [vmem:[%s288_s8 + $0x8] sm:$0xff]  ;;  %s750_s19 = smov [#allocation6]   ;;  %s925_s14 = smov (!%p302_p7, %s736_s14), 1 }
  0x35   : > { %v332_v11 = vrot.slane %v308_v7, 4  ;;  %v383_v15 = vsub.s32 %v380_v5, %v318_v3  ;;  %v369_v25 = vstv %s828_s22  ;;  %v374_v27 = vstv %s832_s24  ;;  %s304_s23 = scalar_lea.vmem %s911_s6, %s925_s14 }
  0x36   : > { %vm840_vm1 = vcmp.eq.s32.totalorder %v319_v4, 0  ;;  %v329_v16 = vsel %vm327_vm0, %v328_v10, %v307_v6  ;;  %v349_v18 = vrot.slane %v323_v8, 1  ;;  %v351_v19 = vrot.slane %v324_v9, 1 }
  0x37   : > { %v333_v17 = vsel %vm327_vm0, %v332_v11, %v308_v7  ;;  %v336_v20 = vrot.slane %v329_v16, 4  ;;  %v357_v22 = vrot.slane %v323_v8, 3  ;;  %v359_v23 = vrot.slane %v324_v9, 3  ;;  %s445_s12 = sadd.f32 %s444_s10, %s832_s24 }
  0x38   : > { %v338_v21 = vrot.slane %v333_v17, 4  ;;  %v373_v26 = vsel %vm840_vm1, %v371_v13, %v372_v14  ;;  %v370_v36 = vsel %vm840_vm1, %v368_v24, %v369_v25  ;;  %v375_v37 = vstv %s838_s28 }
  0x39   : > { %v340_v28 = vsel %vm327_vm0, %v336_v20, %v307_v6  ;;  %v365_v30 = vsel %vm840_vm1, %v349_v18, %v357_v22  ;;  %v367_v31 = vsel %vm840_vm1, %v351_v19, %v359_v23  ;;  %v376_v42 = vsel %vm840_vm1, %v374_v27, %v375_v37  ;;  %s449_s13 = sadd.f32 %s626_s11, %s832_s24 }
  0x3a   : > { %v342_v29 = vsel %vm327_vm0, %v338_v21, %v308_v7  ;;  %v348_v32 = vrot.slane %v340_v28, 1  ;;  %v356_v34 = vrot.slane %v340_v28, 3  ;;  %v389_v38 = vmul.f32 %v373_v26, %v365_v30  ;;  %447 = sst [smem:[#allocation6]] %s445_s12 }
  0x3b   : > { %v350_v33 = vrot.slane %v342_v29, 1  ;;  %v358_v35 = vrot.slane %v342_v29, 3  ;;  %v391_v39 = vmul.f32 %v373_v26, %v367_v31  ;;  %v384_v43 = vrot.slane %v370_v36, %v383_v15  ;;  %451 = sst [smem:[#allocation6 + $0x1]] %s449_s13 }
  0x3c   : > { %v364_v40 = vsel %vm840_vm1, %v348_v32, %v356_v34  ;;  %v409_v50 = vrot.slane %v376_v42, %v383_v15  ;;  %634 = dma.smem_to_hbm (%p880_p6), %s750_s19, 16, %s912_s7, [#allocation7]  }
  0x3d   : > { %v366_v41 = vsel %vm840_vm1, %v350_v33, %v358_v35  ;;  %v388_v44 = vmul.f32 %v373_v26, %v364_v40  ;;  %v386_v46 = vmul.f32 %v384_v43, %v307_v6  ;;  %v387_v47 = vmul.f32 %v384_v43, %v308_v7 }
  0x3e   : > { %v390_v45 = vmul.f32 %v373_v26, %v366_v41 }
  0x3f   : > { %v396_v48 = vcombine.low %v388_v44, %v389_v38 }
  0x40   : > { %v397_v49 = vcombine.low %v390_v45, %v391_v39 }
  0x41   : > { %v400_v51 = vadd.f32 %v396_v48, %v386_v46 }
  0x42   : > { %v401_v52 = vadd.f32 %v397_v49, %v387_v47 }
  0x43   : > { %v411_v55 = vadd.f32 %v409_v50, %v400_v51 }
  0x44   : > { %v412_v56 = vadd.f32 %v409_v50, %v401_v52 }
  0x45   : > { %413 = vst [vmem:[%s298_s1] sm:$0xff] %v411_v55  ;;  %v415_v57 = vsub.f32 %v411_v55, %v309_v53 }
  0x46   : > { %v416_v58 = vsub.f32 %v412_v56, %v310_v54  ;;  %414 = vst [vmem:[%s298_s1 + $0x8] sm:$0xff] %v412_v56 }
  0x47   : > { %v417_v59 = vand.u32 2147483647, %v415_v57 }
  0x48   : > { %v418_v60 = vand.u32 2147483647, %v416_v58 }
  0x49   : > { %v421_v61 = vcombine.high %v417_v59, %v417_v59  ;;  %v426_v63 = vsel %vm425_vm2, %v417_v59, 0.0 }
  0x4a   : > { %v422_v62 = vcombine.high %v418_v60, %v418_v60  ;;  %v429_v1 = vsel %vm425_vm2, %v418_v60, 0.0 }
  0x4b   : > { %v427_v0 = vsel %vm425_vm2, %v421_v61, 0.0 }
  0x4c   : > { %v428_v2 = vadd.f32 %v427_v0, %v426_v63  ;;  %v431_v3 = vsel %vm425_vm2, %v422_v62, 0.0 }
  0x4e   : > { %v430_v4 = vadd.f32 %v429_v1, %v428_v2 }
  0x50   : > { %v432_v5 = vadd.f32 %v431_v3, %v430_v4 }
  0x52   : > { %433 = vadd.xlane.f32.xlu0 %v432_v5 }
  0xdb   : > { %v434_v6 = vpop.xlane.xlu0 %433 }
  0xdc   : > { %v435_v7 = vrot.slane %v434_v6, 4 }
  0xde   : > { %v436_v8 = vadd.f32 %v435_v7, %v434_v6 }
  0xe0   : > { %v437_v9 = vrot.slane %v436_v8, 2 }
  0xe2   : > { %v438_v10 = vadd.f32 %v437_v9, %v436_v8 }
  0xe4   : > { %v439_v11 = vrot.slane %v438_v10, 1 }
  0xe6   : > { %v440_v12 = vadd.f32 %v439_v11, %v438_v10 }
  0xe8   : > { %631 = vpush %v440_v12 }
 0x119   : > { %s632_s24 = spop %631 }
 0x11a   : > { %v442_v13 = vstv %s632_s24 }
 0x11b   : > { %443 = vst [vmem:[%s304_s23] sm:$0x1] %v442_v13 }
 0x11c   : > { %731 = dma.done.wait (%p880_p6), [#allocation7], 16  }
 0x11d   : > { %733 = vsyncadd (%p880_p6), [#allocation7], 4294967280 }
 0x11e   : > { %488 = sfence }
 0x11f PF: > { %s33_s16 = sadd.s32 1, %s744_s16   ;;  %s918_s14 = smov %s740_s15 }
 0x120   : > { %p30_p8 = scmp.ge.s32.totalorder %s33_s16, 4   ;;  %s919_s15 = smov %s921_s17 }
 0x122   :  { %32 = sbr.rel (!%p30_p8) target bundleno = 37 (0x25), region = 84 }
 0x127   :  { %514 = vsyncpa [#allocation7], 1 }
 0x128   :  { %516 = vsyncpa [#allocation7 + $0x1], 1 }

</bundles_post_ra>
